<compile_context>
chip_gen: v7x
topology: tpu7x:2x2x1
jax: 0.10.0
libtpu: 0.0.40
codegen_flags: <defaults>
</compile_context>

<pallas_src>
import numpy as np
import jax
import jax.numpy as jnp
from jax.experimental import pallas as pl
from jax.experimental.pallas import tpu as pltpu


# ----------------------------------------------------------------------------
# Host-side helpers (shape-only constants + conv1 im2col)
# ----------------------------------------------------------------------------
def _conv_out(size, k, stride, pad):
    return (size + 2 * pad - k) // stride + 1


def _im2col(x, kh, kw, stride, pad):
    # x: (B, C, H, W) -> patches (B, Ho*Wo, C*kh*kw); column order (C, kh, kw)
    # matches PyTorch weight.reshape(Cout, Cin*kh*kw).
    B, C, H, W = x.shape
    xp = jnp.pad(x, ((0, 0), (0, 0), (pad, pad), (pad, pad)))
    Ho = _conv_out(H, kh, stride, pad)
    Wo = _conv_out(W, kw, stride, pad)
    cols = []
    for i in range(kh):
        for j in range(kw):
            cols.append(xp[:, :, i:i + stride * Ho:stride, j:j + stride * Wo:stride])
    p = jnp.stack(cols, axis=0).transpose(1, 3, 4, 2, 0)   # (B, Ho, Wo, C, kh*kw)
    return p.reshape(B, Ho * Wo, C * kh * kw), Ho, Wo


def _tap_select(Hin, Win, kh, kw, stride, pad):
    # Per-image row-selection matrix, rows stacked tap-major:
    #   S[k*Mo + m, r] = 1  if output position m takes kernel tap k from input
    #   row r (0 where the tap falls in the zero padding).
    Ho = _conv_out(Hin, kh, stride, pad)
    Wo = _conv_out(Win, kw, stride, pad)
    Mo, Mi = Ho * Wo, Hin * Win
    S = np.zeros((kh * kw * Mo, Mi), np.float32)
    for i in range(kh):
        for j in range(kw):
            k = i * kw + j
            for ho in range(Ho):
                for wo in range(Wo):
                    h = stride * ho - pad + i
                    w = stride * wo - pad + j
                    if 0 <= h < Hin and 0 <= w < Win:
                        S[k * Mo + ho * Wo + wo, h * Win + w] = 1.0
    return S, Ho, Wo


def _pack_consts(b1, b2, b3, wh, bh, w1m):
    # Rows 0..4: b1, b2, b3, head weight, head bias (lane-padded to 128).
    # Rows 8..8+K1: conv1 weight (K1, C1), lane-padded to 128.
    def row(v):
        v = jnp.asarray(v, jnp.float32).reshape(-1)
        return jnp.pad(v, (0, 128 - v.shape[0]))

    zeros = jnp.zeros((128,), jnp.float32)
    head_rows = jnp.stack([row(b1), row(b2), row(b3), row(wh), row(bh),
                           zeros, zeros, zeros])                       # (8, 128)
    w1_rows = jnp.pad(jnp.asarray(w1m, jnp.float32),
                      ((0, 0), (0, 128 - w1m.shape[1])))               # (K1, 128)
    return jnp.concatenate([head_rows, w1_rows], axis=0)               # (8+K1, 128)


# ----------------------------------------------------------------------------
# Forward
# ----------------------------------------------------------------------------
def image_descriminator_forward(params, x):
    # x: (B, image_channels, H, W) float32 (NCHW, matching PyTorch).
    B, Cin, H, W = x.shape
    w1, b1 = params["w1"], params["b1"]
    w2, b2 = params["w2"], params["b2"]
    w3, b3 = params["w3"], params["b3"]
    wh, bh = params["wh"], params["bh"]
    C1, C2, C3 = w1.shape[0], w2.shape[0], w3.shape[0]
    K1 = Cin * 16
    assert max(C1, C2, C3) <= 128 and K1 <= 120, "consts packing assumes <=128 lanes"

    # conv1 im2col on the raw (tiny) input.
    # TODO(synk): conv1's im2col stays as a few fused host-side XLA ops on the
    # 16x16 input; folding it in-kernel would need either a 512 KB per-image
    # selection constant or strided-lane VMEM gathers, both worse/riskier here.
    patches1, H1, W1 = _im2col(x.astype(jnp.float32), 4, 4, 2, 1)      # (B, M1, K1)
    M1 = H1 * W1

    # Per-image 0/1 selection constants (numpy, compile-time), stored bf16.
    S2_np, H2, W2_ = _tap_select(H1, W1, 4, 4, 2, 1)
    S3_np, H3, W3_ = _tap_select(H2, W2_, 3, 3, 2, 1)
    M2, M3 = H2 * W2_, H3 * W3_
    KK2, KK3 = 16, 9

    # Flattened weights: rows ordered (tap, Cin) to match the lane repack.
    w1m = w1.reshape(C1, K1).T                                         # (K1, C1)
    w2f = jnp.transpose(w2, (2, 3, 1, 0)).reshape(KK2 * C1, C2)        # (16*C1, C2)
    w3f = jnp.transpose(w3, (2, 3, 1, 0)).reshape(KK3 * C2, C3)        # (9*C2,  C3)

    consts = _pack_consts(b1, b2, b3, wh, bh, w1m)                     # (8+K1, 128)

    f32 = jnp.float32

    def kernel(p1_ref, c_ref, s2_ref, w2_ref, s3_ref, w3_ref, o_ref):
        c = c_ref[...]
        b1v = c[0:1, 0:C1]
        b2v = c[1:2, 0:C2]
        b3v = c[2:3, 0:C3]
        whv = c[3:4, 0:C3]
        bhv = c[4:5, 0:1]
        w1v = c[8:8 + K1, 0:C1]                                        # (K1, C1)

        # enc1: conv(4x4, s2, p1) + ReLU  (im2col patches from the wrapper)
        a1 = jnp.dot(p1_ref[0], w1v, preferred_element_type=f32)       # (M1, C1)
        a1 = jnp.maximum(a1 + b1v, 0.0)

        # enc2: one gather matmul + lane repack + one weight matmul + ReLU
        g2 = jnp.dot(s2_ref[...].astype(f32), a1,
                     preferred_element_type=f32)                       # (KK2*M2, C1)
        g2 = jnp.concatenate(
            [g2[k * M2:(k + 1) * M2, :] for k in range(KK2)], axis=1)  # (M2, KK2*C1)
        a2 = jnp.dot(g2, w2_ref[...], preferred_element_type=f32)      # (M2, C2)
        a2 = jnp.maximum(a2 + b2v, 0.0)

        # enc3: same pattern
        g3 = jnp.dot(s3_ref[...].astype(f32), a2,
                     preferred_element_type=f32)                       # (KK3*M3, C2)
        g3 = jnp.concatenate(
            [g3[k * M3:(k + 1) * M3, :] for k in range(KK3)], axis=1)  # (M3, KK3*C2)
        a3 = jnp.dot(g3, w3_ref[...], preferred_element_type=f32)      # (M3, C3)
        a3 = jnp.maximum(a3 + b3v, 0.0)

        # AdaptiveAvgPool2d((1,1)): sublane mean. Post-pool ReLU is a no-op
        # (a3 >= 0), so it is dropped.  Linear head: VPU multiply + lane reduce.
        pooled = jnp.mean(a3, axis=0, keepdims=True)                   # (1, C3)
        logit = jnp.sum(pooled * whv, axis=-1, keepdims=True) + bhv    # (1, 1)
        o_ref[...] = logit.reshape(1, 1, 1).astype(o_ref.dtype)

    out = pl.pallas_call(
        kernel,
        out_shape=jax.ShapeDtypeStruct((B, 1, 1), jnp.float32),
        grid_spec=pltpu.PrefetchScalarGridSpec(
            num_scalar_prefetch=0,
            grid=(B,),
            in_specs=[
                pl.BlockSpec((1, M1, K1), lambda b: (b, 0, 0)),        # patches
                pl.BlockSpec(consts.shape, lambda b: (0, 0)),          # packed consts
                pl.BlockSpec(S2_np.shape, lambda b: (0, 0)),           # conv2 select
                pl.BlockSpec((KK2 * C1, C2), lambda b: (0, 0)),        # conv2 weight
                pl.BlockSpec(S3_np.shape, lambda b: (0, 0)),           # conv3 select
                pl.BlockSpec((KK3 * C2, C3), lambda b: (0, 0)),        # conv3 weight
            ],
            out_specs=pl.BlockSpec((1, 1, 1), lambda b: (b, 0, 0)),
        ),
        compiler_params=pltpu.CompilerParams(
            dimension_semantics=("parallel",),   # v7x: split batch across TCs
        ),
    )(patches1, consts,
      jnp.asarray(S2_np, jnp.bfloat16), w2f,
      jnp.asarray(S3_np, jnp.bfloat16), w3f)

    return jnp.squeeze(out)                                            # matches .squeeze()


# ----------------------------------------------------------------------------
# Deterministic parameter init (PyTorch-style uniform fan-in bounds)
# ----------------------------------------------------------------------------
def init_params(key, image_channels=1, init_channels=8):
    ks = jax.random.split(key, 8)
    c1, c2, c3 = init_channels, init_channels * 2, init_channels * 4

    def conv_init(kw_, kb_, cout, cin, kh, kwid):
        fan_in = cin * kh * kwid
        bound = 1.0 / jnp.sqrt(fan_in)
        w = jax.random.uniform(kw_, (cout, cin, kh, kwid), jnp.float32, -bound, bound)
        b = jax.random.uniform(kb_, (cout,), jnp.float32, -bound, bound)
        return w, b

    w1, b1 = conv_init(ks[0], ks[1], c1, image_channels, 4, 4)
    w2, b2 = conv_init(ks[2], ks[3], c2, c1, 4, 4)
    w3, b3 = conv_init(ks[4], ks[5], c3, c2, 3, 3)
    bound = 1.0 / jnp.sqrt(c3)
    wh = jax.random.uniform(ks[6], (1, c3), jnp.float32, -bound, bound)
    bh = jax.random.uniform(ks[7], (1,), jnp.float32, -bound, bound)
    return dict(w1=w1, b1=b1, w2=w2, b2=b2, w3=w3, b3=b3, wh=wh, bh=bh)


def _reference_forward(params, x):
    # Pure-JAX reference of the PyTorch module, for a correctness assert.
    def conv_relu(x, w, b, stride, pad):
        y = jax.lax.conv_general_dilated(
            x, w, window_strides=(stride, stride),
            padding=((pad, pad), (pad, pad)),
            dimension_numbers=("NCHW", "OIHW", "NCHW"),
            precision=jax.lax.Precision.HIGHEST)
        return jnp.maximum(y + b[None, :, None, None], 0.0)

    x = conv_relu(x, params["w1"], params["b1"], 2, 1)
    x = conv_relu(x, params["w2"], params["b2"], 2, 1)
    x = conv_relu(x, params["w3"], params["b3"], 2, 1)
    pooled = jnp.maximum(jnp.mean(x, axis=(2, 3)), 0.0)
    head = jnp.dot(pooled, params["wh"].T, precision=jax.lax.Precision.HIGHEST)
    return jnp.squeeze(head + params["bh"])


if __name__ == "__main__":
    key = jax.random.PRNGKey(0)
    pkey, xkey = jax.random.split(key)
    params = init_params(pkey, image_channels=1, init_channels=8)

    # MNIST-like input: batch=2, channels=1, spatial 16 (16 -> 8 -> 4 -> 2).
    x = jax.random.normal(xkey, (2, 1, 16, 16), jnp.float32)

    out = jax.jit(image_descriminator_forward)(params, x)
    jax.block_until_ready(out)
    assert out.shape == (2,), out.shape

    ref = _reference_forward(params, x)
    assert jnp.allclose(out, ref, atol=1e-3, rtol=1e-3), (out, ref)

    print("KERNEL_OK")
</pallas_src>

<mosaic_0001>
module attributes {stable_mosaic.version = 11 : i64} {
  func.func @kernel(%arg0: i32, %arg1: memref<1x64x16xf32, #tpu.memory_space<vmem>>, %arg2: memref<24x128xf32, #tpu.memory_space<vmem>>, %arg3: memref<256x64xbf16, #tpu.memory_space<vmem>>, %arg4: memref<128x16xf32, #tpu.memory_space<vmem>>, %arg5: memref<36x16xbf16, #tpu.memory_space<vmem>>, %arg6: memref<144x32xf32, #tpu.memory_space<vmem>>, %arg7: memref<1x1x1xf32, #tpu.memory_space<vmem>>) attributes {dimension_semantics = [#tpu.dimension_semantics<parallel>], iteration_bounds = array<i64: 2>, scalar_prefetch = 0 : i64, scratch_operands = 0 : i64, tpu.core_type = #tpu.core_type<tc>, window_params = [{transform_indices = @transform_0, window_bounds = array<i64: 1, 64, 16>}, {pipeline_mode = #tpu.pipeline_mode<synchronous>, transform_indices = @transform_1, window_bounds = array<i64: 24, 128>}, {pipeline_mode = #tpu.pipeline_mode<synchronous>, transform_indices = @transform_2, window_bounds = array<i64: 256, 64>}, {pipeline_mode = #tpu.pipeline_mode<synchronous>, transform_indices = @transform_3, window_bounds = array<i64: 128, 16>}, {pipeline_mode = #tpu.pipeline_mode<synchronous>, transform_indices = @transform_4, window_bounds = array<i64: 36, 16>}, {pipeline_mode = #tpu.pipeline_mode<synchronous>, transform_indices = @transform_5, window_bounds = array<i64: 144, 32>}, {transform_indices = @transform_6, window_bounds = array<i64: 1, 1, 1>}]} {
    %c0 = arith.constant 0 : index
    %c0_0 = arith.constant 0 : index
    %0 = vector.load %arg2[%c0, %c0_0] : memref<24x128xf32, #tpu.memory_space<vmem>>, vector<24x128xf32>
    %1 = vector.extract_strided_slice %0 {offsets = [0, 0], sizes = [1, 8], strides = [1, 1]} : vector<24x128xf32> to vector<1x8xf32>
    %2 = vector.extract_strided_slice %0 {offsets = [1, 0], sizes = [1, 16], strides = [1, 1]} : vector<24x128xf32> to vector<1x16xf32>
    %3 = vector.extract_strided_slice %0 {offsets = [2, 0], sizes = [1, 32], strides = [1, 1]} : vector<24x128xf32> to vector<1x32xf32>
    %4 = vector.extract_strided_slice %0 {offsets = [3, 0], sizes = [1, 32], strides = [1, 1]} : vector<24x128xf32> to vector<1x32xf32>
    %5 = vector.extract_strided_slice %0 {offsets = [4, 0], sizes = [1, 1], strides = [1, 1]} : vector<24x128xf32> to vector<1x1xf32>
    %6 = vector.extract_strided_slice %0 {offsets = [8, 0], sizes = [16, 8], strides = [1, 1]} : vector<24x128xf32> to vector<16x8xf32>
    %c0_1 = arith.constant 0 : index
    %c0_2 = arith.constant 0 : index
    %c0_3 = arith.constant 0 : index
    %7 = vector.load %arg1[%c0_1, %c0_2, %c0_3] : memref<1x64x16xf32, #tpu.memory_space<vmem>>, vector<1x64x16xf32>
    %8 = vector.shape_cast %7 : vector<1x64x16xf32> to vector<64x16xf32>
    %cst = arith.constant dense<0.000000e+00> : vector<64x8xf32>
    %9 = tpu.matmul %8, %6, %cst {dimension_numbers = #tpu.dot_dimension_numbers<[1], [0], [0], [1], [0, 0, 1, 1], [], []>} : vector<64x16xf32>, vector<16x8xf32>, vector<64x8xf32> -> vector<64x8xf32>
    %10 = vector.broadcast %1 : vector<1x8xf32> to vector<64x8xf32>
    %11 = arith.addf %9, %10 : vector<64x8xf32>
    %cst_4 = arith.constant 0.000000e+00 : f32
    %12 = vector.broadcast %cst_4 : f32 to vector<64x8xf32>
    %13 = arith.maximumf %11, %12 : vector<64x8xf32>
    %c0_5 = arith.constant 0 : index
    %c0_6 = arith.constant 0 : index
    %14 = vector.load %arg3[%c0_5, %c0_6] : memref<256x64xbf16, #tpu.memory_space<vmem>>, vector<256x64xbf16>
    %15 = arith.extf %14 : vector<256x64xbf16> to vector<256x64xf32>
    %cst_7 = arith.constant dense<0.000000e+00> : vector<256x8xf32>
    %16 = tpu.matmul %15, %13, %cst_7 {dimension_numbers = #tpu.dot_dimension_numbers<[1], [0], [0], [1], [0, 0, 1, 1], [], []>} : vector<256x64xf32>, vector<64x8xf32>, vector<256x8xf32> -> vector<256x8xf32>
    %17 = vector.extract_strided_slice %16 {offsets = [0, 0], sizes = [16, 8], strides = [1, 1]} : vector<256x8xf32> to vector<16x8xf32>
    %18 = vector.extract_strided_slice %16 {offsets = [16, 0], sizes = [16, 8], strides = [1, 1]} : vector<256x8xf32> to vector<16x8xf32>
    %19 = vector.extract_strided_slice %16 {offsets = [32, 0], sizes = [16, 8], strides = [1, 1]} : vector<256x8xf32> to vector<16x8xf32>
    %20 = vector.extract_strided_slice %16 {offsets = [48, 0], sizes = [16, 8], strides = [1, 1]} : vector<256x8xf32> to vector<16x8xf32>
    %21 = vector.extract_strided_slice %16 {offsets = [64, 0], sizes = [16, 8], strides = [1, 1]} : vector<256x8xf32> to vector<16x8xf32>
    %22 = vector.extract_strided_slice %16 {offsets = [80, 0], sizes = [16, 8], strides = [1, 1]} : vector<256x8xf32> to vector<16x8xf32>
    %23 = vector.extract_strided_slice %16 {offsets = [96, 0], sizes = [16, 8], strides = [1, 1]} : vector<256x8xf32> to vector<16x8xf32>
    %24 = vector.extract_strided_slice %16 {offsets = [112, 0], sizes = [16, 8], strides = [1, 1]} : vector<256x8xf32> to vector<16x8xf32>
    %25 = vector.extract_strided_slice %16 {offsets = [128, 0], sizes = [16, 8], strides = [1, 1]} : vector<256x8xf32> to vector<16x8xf32>
    %26 = vector.extract_strided_slice %16 {offsets = [144, 0], sizes = [16, 8], strides = [1, 1]} : vector<256x8xf32> to vector<16x8xf32>
    %27 = vector.extract_strided_slice %16 {offsets = [160, 0], sizes = [16, 8], strides = [1, 1]} : vector<256x8xf32> to vector<16x8xf32>
    %28 = vector.extract_strided_slice %16 {offsets = [176, 0], sizes = [16, 8], strides = [1, 1]} : vector<256x8xf32> to vector<16x8xf32>
    %29 = vector.extract_strided_slice %16 {offsets = [192, 0], sizes = [16, 8], strides = [1, 1]} : vector<256x8xf32> to vector<16x8xf32>
    %30 = vector.extract_strided_slice %16 {offsets = [208, 0], sizes = [16, 8], strides = [1, 1]} : vector<256x8xf32> to vector<16x8xf32>
    %31 = vector.extract_strided_slice %16 {offsets = [224, 0], sizes = [16, 8], strides = [1, 1]} : vector<256x8xf32> to vector<16x8xf32>
    %32 = vector.extract_strided_slice %16 {offsets = [240, 0], sizes = [16, 8], strides = [1, 1]} : vector<256x8xf32> to vector<16x8xf32>
    %33 = tpu.concatenate %17, %18, %19, %20, %21, %22, %23, %24, %25, %26, %27, %28, %29, %30, %31, %32 in 1 : vector<16x8xf32>, vector<16x8xf32>, vector<16x8xf32>, vector<16x8xf32>, vector<16x8xf32>, vector<16x8xf32>, vector<16x8xf32>, vector<16x8xf32>, vector<16x8xf32>, vector<16x8xf32>, vector<16x8xf32>, vector<16x8xf32>, vector<16x8xf32>, vector<16x8xf32>, vector<16x8xf32>, vector<16x8xf32> -> vector<16x128xf32>
    %c0_8 = arith.constant 0 : index
    %c0_9 = arith.constant 0 : index
    %34 = vector.load %arg4[%c0_8, %c0_9] : memref<128x16xf32, #tpu.memory_space<vmem>>, vector<128x16xf32>
    %cst_10 = arith.constant dense<0.000000e+00> : vector<16x16xf32>
    %35 = tpu.matmul %33, %34, %cst_10 {dimension_numbers = #tpu.dot_dimension_numbers<[1], [0], [0], [1], [0, 0, 1, 1], [], []>} : vector<16x128xf32>, vector<128x16xf32>, vector<16x16xf32> -> vector<16x16xf32>
    %36 = vector.broadcast %2 : vector<1x16xf32> to vector<16x16xf32>
    %37 = arith.addf %35, %36 : vector<16x16xf32>
    %cst_11 = arith.constant 0.000000e+00 : f32
    %38 = vector.broadcast %cst_11 : f32 to vector<16x16xf32>
    %39 = arith.maximumf %37, %38 : vector<16x16xf32>
    %c0_12 = arith.constant 0 : index
    %c0_13 = arith.constant 0 : index
    %40 = vector.load %arg5[%c0_12, %c0_13] : memref<36x16xbf16, #tpu.memory_space<vmem>>, vector<36x16xbf16>
    %41 = arith.extf %40 : vector<36x16xbf16> to vector<36x16xf32>
    %cst_14 = arith.constant dense<0.000000e+00> : vector<36x16xf32>
    %42 = tpu.matmul %41, %39, %cst_14 {dimension_numbers = #tpu.dot_dimension_numbers<[1], [0], [0], [1], [0, 0, 1, 1], [], []>} : vector<36x16xf32>, vector<16x16xf32>, vector<36x16xf32> -> vector<36x16xf32>
    %43 = vector.extract_strided_slice %42 {offsets = [0, 0], sizes = [4, 16], strides = [1, 1]} : vector<36x16xf32> to vector<4x16xf32>
    %44 = vector.extract_strided_slice %42 {offsets = [4, 0], sizes = [4, 16], strides = [1, 1]} : vector<36x16xf32> to vector<4x16xf32>
    %45 = vector.extract_strided_slice %42 {offsets = [8, 0], sizes = [4, 16], strides = [1, 1]} : vector<36x16xf32> to vector<4x16xf32>
    %46 = vector.extract_strided_slice %42 {offsets = [12, 0], sizes = [4, 16], strides = [1, 1]} : vector<36x16xf32> to vector<4x16xf32>
    %47 = vector.extract_strided_slice %42 {offsets = [16, 0], sizes = [4, 16], strides = [1, 1]} : vector<36x16xf32> to vector<4x16xf32>
    %48 = vector.extract_strided_slice %42 {offsets = [20, 0], sizes = [4, 16], strides = [1, 1]} : vector<36x16xf32> to vector<4x16xf32>
    %49 = vector.extract_strided_slice %42 {offsets = [24, 0], sizes = [4, 16], strides = [1, 1]} : vector<36x16xf32> to vector<4x16xf32>
    %50 = vector.extract_strided_slice %42 {offsets = [28, 0], sizes = [4, 16], strides = [1, 1]} : vector<36x16xf32> to vector<4x16xf32>
    %51 = vector.extract_strided_slice %42 {offsets = [32, 0], sizes = [4, 16], strides = [1, 1]} : vector<36x16xf32> to vector<4x16xf32>
    %52 = tpu.concatenate %43, %44, %45, %46, %47, %48, %49, %50, %51 in 1 : vector<4x16xf32>, vector<4x16xf32>, vector<4x16xf32>, vector<4x16xf32>, vector<4x16xf32>, vector<4x16xf32>, vector<4x16xf32>, vector<4x16xf32>, vector<4x16xf32> -> vector<4x144xf32>
    %c0_15 = arith.constant 0 : index
    %c0_16 = arith.constant 0 : index
    %53 = vector.load %arg6[%c0_15, %c0_16] : memref<144x32xf32, #tpu.memory_space<vmem>>, vector<144x32xf32>
    %cst_17 = arith.constant dense<0.000000e+00> : vector<4x32xf32>
    %54 = tpu.matmul %52, %53, %cst_17 {dimension_numbers = #tpu.dot_dimension_numbers<[1], [0], [0], [1], [0, 0, 1, 1], [], []>} : vector<4x144xf32>, vector<144x32xf32>, vector<4x32xf32> -> vector<4x32xf32>
    %55 = vector.broadcast %3 : vector<1x32xf32> to vector<4x32xf32>
    %56 = arith.addf %54, %55 : vector<4x32xf32>
    %cst_18 = arith.constant 0.000000e+00 : f32
    %57 = vector.broadcast %cst_18 : f32 to vector<4x32xf32>
    %58 = arith.maximumf %56, %57 : vector<4x32xf32>
    %cst_19 = arith.constant dense<0.000000e+00> : vector<32xf32>
    %59 = vector.multi_reduction <add>, %58, %cst_19 [0] : vector<4x32xf32> to vector<32xf32>
    %60 = vector.shape_cast %59 : vector<32xf32> to vector<1x32xf32>
    %cst_20 = arith.constant 4.000000e+00 : f32
    %61 = vector.broadcast %cst_20 : f32 to vector<1x32xf32>
    %62 = arith.divf %60, %61 : vector<1x32xf32>
    %63 = arith.mulf %62, %4 : vector<1x32xf32>
    %cst_21 = arith.constant dense<0.000000e+00> : vector<1xf32>
    %64 = vector.multi_reduction <add>, %63, %cst_21 [1] : vector<1x32xf32> to vector<1xf32>
    %65 = vector.shape_cast %64 : vector<1xf32> to vector<1x1xf32>
    %66 = arith.addf %65, %5 : vector<1x1xf32>
    %67 = vector.shape_cast %66 : vector<1x1xf32> to vector<1x1x1xf32>
    %c0_22 = arith.constant 0 : index
    %c0_23 = arith.constant 0 : index
    %c0_24 = arith.constant 0 : index
    %68 = vector.load %arg7[%c0_22, %c0_23, %c0_24] : memref<1x1x1xf32, #tpu.memory_space<vmem>>, vector<1x1x1xf32>
    tpu.vector_store %arg7[%c0_22, %c0_23, %c0_24], %67 {strides = array<i32>} : memref<1x1x1xf32, #tpu.memory_space<vmem>>, vector<1x1x1xf32>,
    return
  }
  func.func @transform_0(%arg0: i32) -> (i32, i32, i32) {
    %c0_i32 = arith.constant 0 : i32
    %c0_i32_0 = arith.constant 0 : i32
    %c0_i32_1 = arith.constant 0 : i32
    return %arg0, %c0_i32, %c0_i32_0 : i32, i32, i32
  }
  func.func @transform_1(%arg0: i32) -> (i32, i32) {
    %c0_i32 = arith.constant 0 : i32
    %c0_i32_0 = arith.constant 0 : i32
    %c0_i32_1 = arith.constant 0 : i32
    return %c0_i32, %c0_i32_0 : i32, i32
  }
  func.func @transform_2(%arg0: i32) -> (i32, i32) {
    %c0_i32 = arith.constant 0 : i32
    %c0_i32_0 = arith.constant 0 : i32
    %c0_i32_1 = arith.constant 0 : i32
    return %c0_i32, %c0_i32_0 : i32, i32
  }
  func.func @transform_3(%arg0: i32) -> (i32, i32) {
    %c0_i32 = arith.constant 0 : i32
    %c0_i32_0 = arith.constant 0 : i32
    %c0_i32_1 = arith.constant 0 : i32
    return %c0_i32, %c0_i32_0 : i32, i32
  }
  func.func @transform_4(%arg0: i32) -> (i32, i32) {
    %c0_i32 = arith.constant 0 : i32
    %c0_i32_0 = arith.constant 0 : i32
    %c0_i32_1 = arith.constant 0 : i32
    return %c0_i32, %c0_i32_0 : i32, i32
  }
  func.func @transform_5(%arg0: i32) -> (i32, i32) {
    %c0_i32 = arith.constant 0 : i32
    %c0_i32_0 = arith.constant 0 : i32
    %c0_i32_1 = arith.constant 0 : i32
    return %c0_i32, %c0_i32_0 : i32, i32
  }
  func.func @transform_6(%arg0: i32) -> (i32, i32, i32) {
    %c0_i32 = arith.constant 0 : i32
    %c0_i32_0 = arith.constant 0 : i32
    %c0_i32_1 = arith.constant 0 : i32
    return %arg0, %c0_i32, %c0_i32_0 : i32, i32, i32
  }
}

</mosaic_0001>

<bundles_post_ra>
// kernel: image_descriminator_forward.1
= control target key start
LH: loop header
LB: loop body
LE: loop exit
PB: predicated region body
PF: predicated region fallthrough
CT: control target
= control target key end

     0   :  { %s1959_s21 = smov 0   ;;  %s2276_s0 = inlined_call_operand.vmem [shape: f32[2,64,16], index: 0, kind: input, shape index: {}]   ;;  %s2277_s1 = inlined_call_operand.vmem [shape: f32[24,128], index: 1, kind: input, shape index: {}]   ;;  %s2278_s2 = inlined_call_operand.vmem [shape: bf16[256,64], index: 2, kind: input, shape index: {}]   ;;  %s2279_s3 = inlined_call_operand.vmem [shape: f32[128,16], index: 3, kind: input, shape index: {}]   ;;  %s2280_s4 = inlined_call_operand.vmem [shape: bf16[36,16], index: 4, kind: input, shape index: {}]   ;;  %s2281_s5 = inlined_call_operand.vmem [shape: f32[144,32], index: 5, kind: input, shape index: {}]   ;;  %s2282_s6 = inlined_call_operand.vmem [shape: f32[2,1,1], index: 6, kind: output, shape index: {}]  }
   0x1 LB: > { %s1362_s22 = sadd.s32 4294967295, %s1904_s21   ;;  %p1366_p0 = scmp.ge.s32.totalorder %s1904_s21, 1  ;;  %s1904_s21 = sphi %s1959_s21, %s16_s21  }
   0x2   : > { %p212_p1 = scmp.lt.s32.totalorder %s1904_s21, 3 }
   0x4   : > { %p213_p2 = pnand %p1366_p0, %p212_p1 }
   0x5   : > { %v249_v0 = vld [vmem:[%s2277_s1 + $0x8] sm:$0xff] (!%p213_p2)  ;;  %v250_v1 = vld [vmem:[%s2277_s1 + $0x10] sm:$0xff] (!%p213_p2)  ;;  %p240_p3 = scmp.lt.s32.totalorder (!%p213_p2), %s1362_s22, 1  ;;  %vm263_vm0 = vcmask (!%p213_p2), 130048   ;;  %v1419_v11 = vld [vmem:[%s2278_s2] sm:$0xff] (!%p213_p2)   ;;  %vm465_vm1 = vcmask (!%p213_p2), 523264   ;;  %v259_v13 = vlaneseq (!%p213_p2) }
   0x6   : > { %216 = sbr.rel (%p213_p2) target bundleno = 1590 (0x636), region = 44  ;;  %v1715_v2 = vpack.c.bf16 (!%p213_p2), %v250_v1, %v249_v0  ;;  %v1420_v12 = vunpack.c.l.bf16 (!%p213_p2), %v1419_v11  ;;  %v1997_v16 = vld [vmem:[%s2277_s1] sm:$0xff] (!%p213_p2)  ;;  %v1490_v46 = vld [vmem:[%s2278_s2 + $0x8] sm:$0xff] (!%p213_p2)   ;;  %v1421_v47 = vunpack.c.h.bf16 (!%p213_p2), %v1419_v11  ;;  %v1491_v49 = vld [vmem:[%s2278_s2 + $0x10] sm:$0xff] (!%p213_p2)   ;;  %s1906_s19 = smov (!%p213_p2), 8   ;;  %vm907_vm2 = vcmask (!%p213_p2), 64512  }
   0x7   : > { %v1991_v14 = vshrl.u32 (!%p213_p2), %v259_v13, 7  ;;  %v1424_v48 = vunpack.c.l.bf16 (!%p213_p2), %v1490_v46  ;;  %v1425_v50 = vunpack.c.h.bf16 (!%p213_p2), %v1490_v46  ;;  %v1428_v51 = vunpack.c.l.bf16 (!%p213_p2), %v1491_v49  ;;  %v1492_v52 = vld [vmem:[%s2278_s2 + $0x18] sm:$0xff] (!%p213_p2)   ;;  %v1493_v55 = vld [vmem:[%s2278_s2 + $0x20] sm:$0xff] (!%p213_p2)   ;;  %v1494_v58 = vld [vmem:[%s2278_s2 + $0x28] sm:$0xff] (!%p213_p2)   ;;  %s1907_s20 = smov (!%p213_p2), 16   ;;  %s1908_s23 = smov (!%p213_p2), 24  }
   0x8   : > { %1716 = vmatprep.subr.bf16.mxu0 (!%p213_p2), %v1715_v2  ;;  %1613 = vmatprep.mubr.msk.f32.mxu1 (!%p213_p2), %vm465_vm1, %v1420_v12  ;;  %v1429_v53 = vunpack.c.h.bf16 (!%p213_p2), %v1491_v49  ;;  %v1432_v54 = vunpack.c.l.bf16 (!%p213_p2), %v1492_v52  ;;  %v1433_v56 = vunpack.c.h.bf16 (!%p213_p2), %v1492_v52  ;;  %v1436_v57 = vunpack.c.l.bf16 (!%p213_p2), %v1493_v55  ;;  %v1495_v61 = vld [vmem:[%s2278_s2 + $0x30] sm:$0xff] (!%p213_p2)   ;;  %v1496_v0 = vld [vmem:[%s2278_s2 + $0x38] sm:$0xff] (!%p213_p2)   ;;  %s1909_s24 = smov (!%p213_p2), 32   ;;  %v951_v46 = vld [vmem:[%s2279_s3 + $0x8] sm:$0xff] (!%p213_p2)  ;;  %s1910_s29 = smov (!%p213_p2), 40  }
   0x9   : > { %1718 = vmatpush3.bf16.msra.mxu0 (!%p213_p2), %v1715_v2  ;;  %v261_v15 = vsub.s32 (!%p213_p2), 0, %v1991_v14  ;;  %v1437_v59 = vunpack.c.h.bf16 (!%p213_p2), %v1493_v55  ;;  %v1440_v60 = vunpack.c.l.bf16 (!%p213_p2), %v1494_v58  ;;  %v1441_v62 = vunpack.c.h.bf16 (!%p213_p2), %v1494_v58  ;;  %v1500_v12 = vld [vmem:[%s2278_s2 + $0x58] sm:$0xff] (!%p213_p2)   ;;  %s1911_s10 = smov (!%p213_p2), 48   ;;  %v955_v58 = vld [vmem:[%s2279_s3 + $0x28] sm:$0xff] (!%p213_p2)  ;;  %s1912_s15 = smov (!%p213_p2), 56  }
   0xa   : > { %v1444_v63 = vunpack.c.l.bf16 (!%p213_p2), %v1495_v61  ;;  %v1445_v1 = vunpack.c.h.bf16 (!%p213_p2), %v1495_v61  ;;  %v1448_v2 = vunpack.c.l.bf16 (!%p213_p2), %v1496_v0  ;;  %v953_v52 = vld [vmem:[%s2279_s3 + $0x18] sm:$0xff] (!%p213_p2)  ;;  %s1915_s11 = smov (!%p213_p2), 80   ;;  %s1916_s16 = smov (!%p213_p2), 88   ;;  %vm912_vm3 = vcmask (!%p213_p2), 195584  }
   0xb   : > { %v262_v17 = vrot.slane (!%p213_p2), %v1997_v16, %v261_v15  ;;  %v1464_v15 = vunpack.c.l.bf16 (!%p213_p2), %v1500_v12  ;;  %s1917_s26 = smov (!%p213_p2), 96   ;;  %s1919_s28 = smov (!%p213_p2), 112   ;;  %vm915_vm4 = vcmask (!%p213_p2), 261120   ;;  %vm918_vm5 = vcmask (!%p213_p2), 326656  }
   0xc   : > { %vm921_vm6 = vcmask (!%p213_p2), 392192   ;;  %vm924_vm7 = vcmask (!%p213_p2), 457728   ;;  %vm929_vm8 = vcmask (!%p213_p2), 588800   ;;  %vm932_vm9 = vcmask (!%p213_p2), 654336  }
   0xd   : > { %s2284_s22 = smov (!%p240_p3, %s1362_s22), 1  ;;  %vm935_vm10 = vcmask 719872   ;;  %vm938_vm11 = vcmask 785408   ;;  %vm941_vm12 = vcmask 850944   ;;  %vm944_vm13 = vcmask 916480  }
   0xe   : > { %s1417_s27 = sshll.u32 %s2284_s22, 6  ;;  %vm947_vm14 = vcmask 982016   ;;  %vm1922_vm15 = vmmov 0  }
   0xf   : > { %s244_s30 = scalar_lea.vmem %s2276_s0, %s1417_s27  ;;  %s1918_s27 = smov 104  }
  0x10   : > { %v251_v3 = vld [vmem:[%s244_s30] sm:$0xff]  ;;  %v252_v4 = vld [vmem:[%s244_s30 + $0x8] sm:$0xff]  ;;  %v253_v5 = vld [vmem:[%s244_s30 + $0x10] sm:$0xff] }
  0x11   : > { %1585 = vmatprep.mubr.msk.f32.mxu0 %vm263_vm0, %v251_v3  ;;  %v254_v6 = vld [vmem:[%s244_s30 + $0x18] sm:$0xff]  ;;  %v255_v7 = vld [vmem:[%s244_s30 + $0x20] sm:$0xff]  ;;  %v256_v8 = vld [vmem:[%s244_s30 + $0x28] sm:$0xff] }
  0x12   : > { %1586 = vmatmul.mubr.msk.f32.vlgmr.msra.gmra.mrb[0].mxu0 %vm263_vm0, %v252_v4  ;;  %v257_v9 = vld [vmem:[%s244_s30 + $0x30] sm:$0xff]  ;;  %v258_v10 = vld [vmem:[%s244_s30 + $0x38] sm:$0xff]  ;;  %v1497_v3 = vld [vmem:[%s2278_s2 + $0x40] sm:$0xff]   ;;  %v1449_v4 = vunpack.c.h.bf16 %v1496_v0 }
  0x13   : > { %1588 = vmatprep.mubr.msk.f32.mxu0 %vm263_vm0, %v253_v5  ;;  %v1452_v5 = vunpack.c.l.bf16 %v1497_v3  ;;  %v957_v0 = vld [vmem:[%s2279_s3 + $0x38] sm:$0xff] }
  0x16   : > { %1589 = vmatmul.mubr.msk.f32.gmra.mrb[2].mxu0 %vm263_vm0, %v254_v6  ;;  %v1498_v6 = vld [vmem:[%s2278_s2 + $0x48] sm:$0xff]  }
  0x17   : > { %1591 = vmatprep.mubr.msk.f32.mxu0 %vm263_vm0, %v255_v7  ;;  %v1453_v7 = vunpack.c.h.bf16 %v1497_v3 }
  0x1a   : > { %1592 = vmatmul.mubr.msk.f32.gmra.mrb[4].mxu0 %vm263_vm0, %v256_v8  ;;  %v1456_v8 = vunpack.c.l.bf16 %v1498_v6 }
  0x1b   : > { %1594 = vmatprep.mubr.msk.f32.mxu0 %vm263_vm0, %v257_v9  ;;  %v1499_v9 = vld [vmem:[%s2278_s2 + $0x50] sm:$0xff]  }
  0x1c   : > { %v1460_v11 = vunpack.c.l.bf16 %v1499_v9  ;;  %v1461_v13 = vunpack.c.h.bf16 %v1499_v9 }
  0x1e   : > { %1595 = vmatmul.mubr.msk.f32.gmra.mrb[6].mxu0 %vm263_vm0, %v258_v10  ;;  %v1457_v10 = vunpack.c.h.bf16 %v1498_v6  ;;  %v959_v6 = vld [vmem:[%s2279_s3 + $0x48] sm:$0xff] }
  0xe5   : > { %v1587_v18 = vpop.f32.mrb[0].mxu0 }
  0xe6   : > { %v360_v19 = vadd.f32 %v1587_v18, %v262_v17  ;;  %v354_v20 = vpop.f32.mrb[1].mxu0  ;;  %v1465_v18 = vunpack.c.h.bf16 %v1500_v12  ;;  %v961_v12 = vld [vmem:[%s2279_s3 + $0x58] sm:$0xff] }
  0xe7   : > { %v355_v21 = vadd.f32 %v354_v20, %v262_v17  ;;  %v1502_v20 = vld [vmem:[%s2278_s2 + $0x68] sm:$0xff]  }
  0xe8   : > { %v394_v22 = vmax.f32 %v360_v19, 0.0 }
  0xe9   : > { %v393_v23 = vmax.f32 %v355_v21, 0.0  ;;  %v1590_v24 = vpop.f32.mrb[2].mxu0 }
  0xea   : > { %v370_v25 = vadd.f32 %v1590_v24, %v262_v17  ;;  %v364_v26 = vpop.f32.mrb[3].mxu0  ;;  %v1473_v24 = vunpack.c.h.bf16 %v1502_v20 }
  0xeb   : > { %v365_v27 = vadd.f32 %v364_v26, %v262_v17  ;;  %v1719_v28 = vpack.c.bf16 %v394_v22, %v393_v23  ;;  %v1472_v22 = vunpack.c.l.bf16 %v1502_v20  ;;  %v1503_v23 = vld [vmem:[%s2278_s2 + $0x70] sm:$0xff]   ;;  %v1504_v26 = vld [vmem:[%s2278_s2 + $0x78] sm:$0xff]   ;;  %v963_v20 = vld [vmem:[%s2279_s3 + $0x68] sm:$0xff] }
  0xec   : > { %v396_v29 = vmax.f32 %v370_v25, 0.0  ;;  %v1476_v25 = vunpack.c.l.bf16 %v1503_v23 }
  0xed   : > { %v395_v30 = vmax.f32 %v365_v27, 0.0  ;;  %v1593_v31 = vpop.f32.mrb[4].mxu0  ;;  %1720 = vmatprep.subr.bf16.mxu1 %v1719_v28  ;;  %v1477_v27 = vunpack.c.h.bf16 %v1503_v23 }
  0xee   : > { %v380_v32 = vadd.f32 %v1593_v31, %v262_v17  ;;  %v374_v33 = vpop.f32.mrb[5].mxu0  ;;  %1722 = vmatpush3.bf16.msra.mxu1 %v1719_v28  ;;  %v1480_v28 = vunpack.c.l.bf16 %v1504_v26 }
  0xef   : > { %v1723_v34 = vpack.c.bf16 %v396_v29, %v395_v30  ;;  %v375_v35 = vadd.f32 %v374_v33, %v262_v17  ;;  %v1481_v29 = vunpack.c.h.bf16 %v1504_v26  ;;  %v965_v26 = vld [vmem:[%s2279_s3 + $0x78] sm:$0xff] }
  0xf0   : > { %v398_v36 = vmax.f32 %v380_v32, 0.0 }
  0xf1   : > { %v397_v37 = vmax.f32 %v375_v35, 0.0  ;;  %v1596_v38 = vpop.f32.mrb[6].mxu0  ;;  %1724 = vmatprep.subr.bf16.mxu1 %v1723_v34 }
  0xf2   : > { %v390_v39 = vadd.f32 %v1596_v38, %v262_v17  ;;  %v384_v40 = vpop.f32.mrb[7].mxu0  ;;  %1726 = vmatpush3.bf16.msra.mxu1 %v1723_v34 }
  0xf3   : > { %v1727_v41 = vpack.c.bf16 %v398_v36, %v397_v37  ;;  %v385_v42 = vadd.f32 %v384_v40, %v262_v17  ;;  %v1501_v17 = vld [vmem:[%s2278_s2 + $0x60] sm:$0xff]  }
  0xf4   : > { %v400_v43 = vmax.f32 %v390_v39, 0.0  ;;  %v1468_v19 = vunpack.c.l.bf16 %v1501_v17  ;;  %v1469_v21 = vunpack.c.h.bf16 %v1501_v17 }
  0xf5   : > { %v399_v44 = vmax.f32 %v385_v42, 0.0  ;;  %1728 = vmatprep.subr.bf16.mxu1 %v1727_v41 }
  0xf6   : > { %1730 = vmatpush3.bf16.msra.mxu1 %v1727_v41 }
  0xf7   : > { %v1731_v45 = vpack.c.bf16 %v400_v43, %v399_v44 }
  0xf9   : > { %1732 = vmatprep.subr.bf16.mxu1 %v1731_v45 }
  0xfa   : > { %1734 = vmatpush3.bf16.msra.mxu1 %v1731_v45  ;;  %v950_v45 = vld [vmem:[%s2279_s3] sm:$0xff] }
  0xfd   : > { %1614 = vmatmul.mubr.msk.f32.vlgmr.msra.gmra.mrb[0].mxu1 %vm465_vm1, %v1421_v47 }
  0xfe   : > { %1616 = vmatprep.mubr.msk.f32.mxu1 %vm465_vm1, %v1424_v48  ;;  %v1735_v48 = vpack.c.bf16 %v951_v46, %v950_v45 }
 0x100   : > { %1736 = vmatprep.subr.bf16.mxu0 %v1735_v48 }
 0x101   : > { %1617 = vmatmul.mubr.msk.f32.gmra.mrb[2].mxu1 %vm465_vm1, %v1425_v50  ;;  %1738 = vmatpush3.bf16.msra.mxu0 %v1735_v48 }
 0x102   : > { %1619 = vmatprep.mubr.msk.f32.mxu1 %vm465_vm1, %v1428_v51  ;;  %v952_v51 = vld [vmem:[%s2279_s3 + $0x10] sm:$0xff] }
 0x105   : > { %1620 = vmatmul.mubr.msk.f32.gmra.mrb[4].mxu1 %vm465_vm1, %v1429_v53 }
 0x106   : > { %1622 = vmatprep.mubr.msk.f32.mxu1 %vm465_vm1, %v1432_v54  ;;  %v1739_v54 = vpack.c.bf16 %v953_v52, %v952_v51 }
 0x108   : > { %1740 = vmatprep.subr.bf16.mxu0 %v1739_v54 }
 0x109   : > { %1623 = vmatmul.mubr.msk.f32.gmra.mrb[6].mxu1 %vm465_vm1, %v1433_v56  ;;  %1742 = vmatpush3.bf16.msra.mxu0 %v1739_v54 }
 0x10a   : > { %1625 = vmatprep.mubr.msk.f32.mxu1 %vm465_vm1, %v1436_v57  ;;  %v954_v57 = vld [vmem:[%s2279_s3 + $0x20] sm:$0xff] }
 0x10d   : > { %1626 = vmatmul.mubr.msk.f32.gmra.mrb[8].mxu1 %vm465_vm1, %v1437_v59 }
 0x10e   : > { %1628 = vmatprep.mubr.msk.f32.mxu1 %vm465_vm1, %v1440_v60  ;;  %v1743_v60 = vpack.c.bf16 %v955_v58, %v954_v57 }
 0x110   : > { %1744 = vmatprep.subr.bf16.mxu0 %v1743_v60 }
 0x111   : > { %1629 = vmatmul.mubr.msk.f32.gmra.mrb[10].mxu1 %vm465_vm1, %v1441_v62  ;;  %1746 = vmatpush3.bf16.msra.mxu0 %v1743_v60 }
 0x112   : > { %1631 = vmatprep.mubr.msk.f32.mxu1 %vm465_vm1, %v1444_v63  ;;  %v956_v63 = vld [vmem:[%s2279_s3 + $0x30] sm:$0xff] }
 0x115   : > { %1632 = vmatmul.mubr.msk.f32.gmra.mrb[12].mxu1 %vm465_vm1, %v1445_v1 }
 0x116   : > { %1634 = vmatprep.mubr.msk.f32.mxu1 %vm465_vm1, %v1448_v2  ;;  %v1747_v2 = vpack.c.bf16 %v957_v0, %v956_v63 }
 0x118   : > { %1748 = vmatprep.subr.bf16.mxu0 %v1747_v2 }
 0x119   : > { %1635 = vmatmul.mubr.msk.f32.gmra.mrb[14].mxu1 %vm465_vm1, %v1449_v4  ;;  %1750 = vmatpush3.bf16.msra.mxu0 %v1747_v2 }
 0x11a   : > { %1637 = vmatprep.mubr.msk.f32.mxu1 %vm465_vm1, %v1452_v5  ;;  %v958_v5 = vld [vmem:[%s2279_s3 + $0x40] sm:$0xff] }
 0x11d   : > { %1638 = vmatmul.mubr.msk.f32.gmra.mrb[16].mxu1 %vm465_vm1, %v1453_v7 }
 0x11e   : > { %1640 = vmatprep.mubr.msk.f32.mxu1 %vm465_vm1, %v1456_v8  ;;  %v1751_v8 = vpack.c.bf16 %v959_v6, %v958_v5 }
 0x120   : > { %1752 = vmatprep.subr.bf16.mxu0 %v1751_v8 }
 0x121   : > { %1641 = vmatmul.mubr.msk.f32.gmra.mrb[18].mxu1 %vm465_vm1, %v1457_v10  ;;  %1754 = vmatpush3.bf16.msra.mxu0 %v1751_v8 }
 0x122   : > { %1643 = vmatprep.mubr.msk.f32.mxu1 %vm465_vm1, %v1460_v11  ;;  %v960_v11 = vld [vmem:[%s2279_s3 + $0x50] sm:$0xff] }
 0x125   : > { %1644 = vmatmul.mubr.msk.f32.gmra.mrb[20].mxu1 %vm465_vm1, %v1461_v13 }
 0x126   : > { %1646 = vmatprep.mubr.msk.f32.mxu1 %vm465_vm1, %v1464_v15  ;;  %v1755_v15 = vpack.c.bf16 %v961_v12, %v960_v11 }
 0x128   : > { %1756 = vmatprep.subr.bf16.mxu0 %v1755_v15 }
 0x129   : > { %1647 = vmatmul.mubr.msk.f32.gmra.mrb[22].mxu1 %vm465_vm1, %v1465_v18  ;;  %1758 = vmatpush3.bf16.msra.mxu0 %v1755_v15 }
 0x12a   : > { %1649 = vmatprep.mubr.msk.f32.mxu1 %vm465_vm1, %v1468_v19  ;;  %v962_v19 = vld [vmem:[%s2279_s3 + $0x60] sm:$0xff] }
 0x12d   : > { %1650 = vmatmul.mubr.msk.f32.gmra.mrb[24].mxu1 %vm465_vm1, %v1469_v21 }
 0x12e   : > { %1652 = vmatprep.mubr.msk.f32.mxu1 %vm465_vm1, %v1472_v22  ;;  %v1759_v22 = vpack.c.bf16 %v963_v20, %v962_v19 }
 0x130   : > { %1760 = vmatprep.subr.bf16.mxu0 %v1759_v22 }
 0x131   : > { %1653 = vmatmul.mubr.msk.f32.gmra.mrb[26].mxu1 %vm465_vm1, %v1473_v24  ;;  %1762 = vmatpush3.bf16.msra.mxu0 %v1759_v22 }
 0x132   : > { %1655 = vmatprep.mubr.msk.f32.mxu1 %vm465_vm1, %v1476_v25  ;;  %v964_v25 = vld [vmem:[%s2279_s3 + $0x70] sm:$0xff] }
 0x135   : > { %1656 = vmatmul.mubr.msk.f32.gmra.mrb[28].mxu1 %vm465_vm1, %v1477_v27 }
 0x136   : > { %1658 = vmatprep.mubr.msk.f32.mxu1 %vm465_vm1, %v1480_v28  ;;  %v1763_v28 = vpack.c.bf16 %v965_v26, %v964_v25 }
 0x138   : > { %1764 = vmatprep.subr.bf16.mxu0 %v1763_v28 }
 0x139   : > { %1659 = vmatmul.mubr.msk.f32.gmra.mrb[30].mxu1 %vm465_vm1, %v1481_v29  ;;  %1766 = vmatpush3.bf16.msra.mxu0 %v1763_v28 }
 0x1d0   : > { %v2076_v30 = vpop.f32.mrb[0].mxu1 }
 0x1d1   : > { %v2078_v31 = vpop.f32.mrb[1].mxu1 }
 0x1d4   : > { %v1618_v32 = vpop.f32.mrb[2].mxu1 }
 0x1d5   : > { %v638_v33 = vpop.f32.mrb[3].mxu1 }
 0x1d6   : > { %v1823_v34 = vpack.i.bf16 %v1618_v32, %v638_v33 }
 0x1d8   : > { %1824 = vrot.lane.b32.xlu0 %v1823_v34, %s1906_s19  ;;  %v1621_v35 = vpop.f32.mrb[4].mxu1 }
 0x1d9   : > { %v648_v36 = vpop.f32.mrb[5].mxu1 }
 0x1da   : > { %v1828_v37 = vpack.i.bf16 %v1621_v35, %v648_v36 }
 0x1dc   : > { %1829 = vrot.lane.b32.xlu0 %v1828_v37, %s1907_s20  ;;  %v1624_v38 = vpop.f32.mrb[6].mxu1 }
 0x1dd   : > { %v658_v39 = vpop.f32.mrb[7].mxu1 }
 0x1de   : > { %v1833_v40 = vpack.i.bf16 %v1624_v38, %v658_v39 }
 0x1e0   : > { %1834 = vrot.lane.b32.xlu1 %v1833_v40, %s1908_s23  ;;  %v1627_v41 = vpop.f32.mrb[8].mxu1  ;;  %s1913_s23 = smov 64  }
 0x1e1   : > { %v668_v42 = vpop.f32.mrb[9].mxu1 }
 0x1e2   : > { %v1838_v43 = vpack.i.bf16 %v1627_v41, %v668_v42 }
 0x1e4   : > { %1839 = vrot.lane.b32.xlu1 %v1838_v43, %s1909_s24  ;;  %v1630_v44 = vpop.f32.mrb[10].mxu1 }
 0x1e5   : > { %v678_v47 = vpop.f32.mrb[11].mxu1 }
 0x1e6   : > { %v1843_v49 = vpack.i.bf16 %v1630_v44, %v678_v47 }
 0x1e8   : > { %1844 = vrot.lane.b32.xlu0 %v1843_v49, %s1910_s29  ;;  %v1633_v50 = vpop.f32.mrb[12].mxu1  ;;  %s1914_s29 = smov 72  }
 0x1e9   : > { %v688_v53 = vpop.f32.mrb[13].mxu1 }
 0x1ea   : > { %v1848_v55 = vpack.i.bf16 %v1633_v50, %v688_v53 }
 0x1ec   : > { %1849 = vrot.lane.b32.xlu1 %v1848_v55, %s1911_s10  ;;  %v1636_v56 = vpop.f32.mrb[14].mxu1 }
 0x1ed   : > { %v698_v59 = vpop.f32.mrb[15].mxu1 }
 0x1ee   : > { %v1853_v61 = vpack.i.bf16 %v1636_v56, %v698_v59 }
 0x1f0   : > { %1854 = vrot.lane.b32.xlu0 %v1853_v61, %s1912_s15  ;;  %v1639_v62 = vpop.f32.mrb[16].mxu1 }
 0x1f1   : > { %v708_v1 = vpop.f32.mrb[17].mxu1 }
 0x1f2   : > { %v1858_v3 = vpack.i.bf16 %v1639_v62, %v708_v1 }
 0x1f4   : > { %1859 = vrot.lane.b32.xlu1 %v1858_v3, %s1913_s23  ;;  %v1642_v4 = vpop.f32.mrb[18].mxu1 }
 0x1f5   : > { %v718_v7 = vpop.f32.mrb[19].mxu1 }
 0x1f6   : > { %v1863_v9 = vpack.i.bf16 %v1642_v4, %v718_v7 }
 0x1f8   : > { %1864 = vrot.lane.b32.xlu0 %v1863_v9, %s1914_s29  ;;  %v1645_v10 = vpop.f32.mrb[20].mxu1  ;;  %s1920_s29 = smov 120  }
 0x1f9   : > { %v728_v13 = vpop.f32.mrb[21].mxu1 }
 0x1fa   : > { %v1868_v17 = vpack.i.bf16 %v1645_v10, %v728_v13 }
 0x1fc   : > { %1869 = vrot.lane.b32.xlu1 %v1868_v17, %s1915_s11  ;;  %v1648_v18 = vpop.f32.mrb[22].mxu1 }
 0x1fd   : > { %v738_v21 = vpop.f32.mrb[23].mxu1 }
 0x1fe   : > { %v1873_v23 = vpack.i.bf16 %v1648_v18, %v738_v21 }
 0x200   : > { %1874 = vrot.lane.b32.xlu0 %v1873_v23, %s1916_s16  ;;  %v1651_v24 = vpop.f32.mrb[24].mxu1 }
 0x201   : > { %v748_v27 = vpop.f32.mrb[25].mxu1 }
 0x202   : > { %v1878_v29 = vpack.i.bf16 %v1651_v24, %v748_v27 }
 0x204   : > { %1879 = vrot.lane.b32.xlu1 %v1878_v29, %s1917_s26  ;;  %v1654_v32 = vpop.f32.mrb[26].mxu1 }
 0x205   : > { %v758_v33 = vpop.f32.mrb[27].mxu1 }
 0x206   : > { %v1883_v34 = vpack.i.bf16 %v1654_v32, %v758_v33 }
 0x208   : > { %1884 = vrot.lane.b32.xlu0 %v1883_v34, %s1918_s27  ;;  %v1657_v35 = vpop.f32.mrb[28].mxu1 }
 0x209   : > { %v768_v36 = vpop.f32.mrb[29].mxu1 }
 0x20a   : > { %v1888_v37 = vpack.i.bf16 %v1657_v35, %v768_v36 }
 0x20c   : > { %1889 = vrot.lane.b32.xlu1 %v1888_v37, %s1919_s28  ;;  %v1660_v38 = vpop.f32.mrb[30].mxu1 }
 0x20d   : > { %v778_v39 = vpop.f32.mrb[31].mxu1 }
 0x20e   : > { %v1893_v40 = vpack.i.bf16 %v1660_v38, %v778_v39 }
 0x210   : > { %1894 = vrot.lane.b32.xlu0 %v1893_v40, %s1920_s29 }
 0x24a   : > { %v1825_v41 = vpop.permute.xlu0 %1824 }
 0x24b   : > { %v1827_v49 = vunpack.i.h.bf16 %v1825_v41  ;;  %v1826_v50 = vunpack.i.l.bf16 %v1825_v41 }
 0x24d   : > { %v909_v59 = vsel %vm907_vm2, %v2076_v30, %v1827_v49  ;;  %v908_v60 = vsel %vm907_vm2, %v2078_v31, %v1826_v50  ;;  %vm1313_vm2 = vcmask 3075  }
 0x24e   : > { %v1830_v43 = vpop.permute.xlu0 %1829 }
 0x24f   : > { %v1832_v51 = vunpack.i.h.bf16 %v1830_v43  ;;  %v1831_v52 = vunpack.i.l.bf16 %v1830_v43 }
 0x251   : > { %v911_v63 = vsel %vm263_vm0, %v909_v59, %v1832_v51  ;;  %v910_v0 = vsel %vm263_vm0, %v908_v60, %v1831_v52 }
 0x252   : > { %v1835_v42 = vpop.permute.xlu1 %1834 }
 0x253   : > { %v1837_v54 = vunpack.i.h.bf16 %v1835_v42  ;;  %v1836_v55 = vunpack.i.l.bf16 %v1835_v42 }
 0x255   : > { %v914_v4 = vsel %vm912_vm3, %v911_v63, %v1837_v54  ;;  %v913_v5 = vsel %vm912_vm3, %v910_v0, %v1836_v55  ;;  %v1921_v54 = vmov 0.0|0.0   ;;  %v1923_v55 = vmov 0.0   ;;  %v1483_v0 = vld [vmem:[%s2280_s4] sm:$0xff]  }
 0x256   : > { %v1840_v44 = vpop.permute.xlu1 %1839  ;;  %1767 = vmatprep.subr.bf16.mxu0 %v1921_v54 }
 0x257   : > { %v1842_v56 = vunpack.i.h.bf16 %v1840_v44  ;;  %v1841_v57 = vunpack.i.l.bf16 %v1840_v44 }
 0x259   : > { %v917_v7 = vsel %vm915_vm4, %v914_v4, %v1842_v56  ;;  %v916_v31 = vsel %vm915_vm4, %v913_v5, %v1841_v57  ;;  %v968_v56 = vsub.s32 1, %v1991_v14  ;;  %v1505_v4 = vld [vmem:[%s2280_s4 + $0x8] sm:$0xff]  }
 0x25a   : > { %v1845_v45 = vpop.permute.xlu0 %1844  ;;  %v1488_v5 = vunpack.c.l.bf16 %v1505_v4 }
 0x25b   : > { %v1847_v61 = vunpack.i.h.bf16 %v1845_v45  ;;  %v1846_v62 = vunpack.i.l.bf16 %v1845_v45  ;;  %v969_v57 = vrot.slane %v1997_v16, %v968_v56 }
 0x25d   : > { %v920_v11 = vsel %vm918_vm5, %v917_v7, %v1847_v61  ;;  %v919_v12 = vsel %vm918_vm5, %v916_v31, %v1846_v62  ;;  %v1198_v31 = vld [vmem:[%s2281_s5] sm:$0xff] }
 0x25e   : > { %v1850_v46 = vpop.permute.xlu1 %1849 }
 0x25f   : > { %v1852_v1 = vunpack.i.h.bf16 %v1850_v46  ;;  %v1851_v2 = vunpack.i.l.bf16 %v1850_v46 }
 0x261   : > { %v923_v17 = vsel %vm921_vm6, %v920_v11, %v1852_v1  ;;  %v922_v18 = vsel %vm921_vm6, %v919_v12, %v1851_v2  ;;  %v1484_v2 = vunpack.c.l.bf16 %v1483_v0  ;;  %v1201_v11 = vld [vmem:[%s2281_s5 + $0x18] sm:$0xff] }
 0x262   : > { %v1855_v47 = vpop.permute.xlu0 %1854 }
 0x263   : > { %v1857_v6 = vunpack.i.h.bf16 %v1855_v47  ;;  %v1856_v30 = vunpack.i.l.bf16 %v1855_v47 }
 0x265   : > { %v926_v22 = vsel %vm924_vm7, %v923_v17, %v1857_v6  ;;  %v925_v23 = vsel %vm924_vm7, %v922_v18, %v1856_v30  ;;  %v1489_v6 = vunpack.c.h.bf16 %v1505_v4  ;;  %v1051_v30 = vld [vmem:[%s2280_s4 + $0x10] sm:$0x3] }
 0x266   : > { %v1860_v48 = vpop.permute.xlu1 %1859  ;;  %v1056_v7 = vunpack.c.l.bf16 %v1051_v30  ;;  %v1204_v18 = vld [vmem:[%s2281_s5 + $0x30] sm:$0xff] }
 0x267   : > { %v1862_v8 = vunpack.i.h.bf16 %v1860_v48  ;;  %v1861_v9 = vunpack.i.l.bf16 %v1860_v48 }
 0x269   : > { %v928_v26 = vsel %vm465_vm1, %v926_v22, %v1862_v8  ;;  %v927_v27 = vsel %vm465_vm1, %v925_v23, %v1861_v9  ;;  %v1199_v8 = vld [vmem:[%s2281_s5 + $0x8] sm:$0xff]  ;;  %v1200_v9 = vld [vmem:[%s2281_s5 + $0x10] sm:$0xff] }
 0x26a   : > { %v1865_v53 = vpop.permute.xlu0 %1864  ;;  %v1774_v12 = vpack.c.bf16 %v1201_v11, %v1200_v9  ;;  %v1207_v22 = vld [vmem:[%s2281_s5 + $0x48] sm:$0xff] }
 0x26b   : > { %v1867_v13 = vunpack.i.h.bf16 %v1865_v53  ;;  %v1866_v15 = vunpack.i.l.bf16 %v1865_v53 }
 0x26d   : > { %v931_v33 = vsel %vm929_vm8, %v928_v26, %v1867_v13  ;;  %v930_v34 = vsel %vm929_vm8, %v927_v27, %v1866_v15  ;;  %v1202_v13 = vld [vmem:[%s2281_s5 + $0x20] sm:$0xff]  ;;  %v1203_v15 = vld [vmem:[%s2281_s5 + $0x28] sm:$0xff] }
 0x26e   : > { %v1870_v58 = vpop.permute.xlu1 %1869  ;;  %v1777_v17 = vpack.c.bf16 %v1203_v15, %v1202_v13  ;;  %v1210_v27 = vld [vmem:[%s2281_s5 + $0x60] sm:$0xff] }
 0x26f   : > { %v1872_v19 = vunpack.i.h.bf16 %v1870_v58  ;;  %v1871_v20 = vunpack.i.l.bf16 %v1870_v58 }
 0x271   : > { %v934_v37 = vsel %vm932_vm9, %v931_v33, %v1872_v19  ;;  %v933_v38 = vsel %vm932_vm9, %v930_v34, %v1871_v20  ;;  %v1205_v19 = vld [vmem:[%s2281_s5 + $0x38] sm:$0xff] }
 0x272   : > { %v1875_v3 = vpop.permute.xlu0 %1874  ;;  %v1780_v20 = vpack.c.bf16 %v1205_v19, %v1204_v18  ;;  %v1213_v33 = vld [vmem:[%s2281_s5 + $0x78] sm:$0xff] }
 0x273   : > { %v1877_v24 = vunpack.i.h.bf16 %v1875_v3  ;;  %v1876_v25 = vunpack.i.l.bf16 %v1875_v3  ;;  %v1485_v3 = vunpack.c.h.bf16 %v1483_v0 }
 0x275   : > { %v937_v41 = vsel %vm935_vm10, %v934_v37, %v1877_v24  ;;  %v936_v42 = vsel %vm935_vm10, %v933_v38, %v1876_v25  ;;  %v1208_v24 = vld [vmem:[%s2281_s5 + $0x50] sm:$0xff]  ;;  %v1209_v25 = vld [vmem:[%s2281_s5 + $0x58] sm:$0xff] }
 0x276   : > { %v1880_v10 = vpop.permute.xlu1 %1879  ;;  %v1786_v26 = vpack.c.bf16 %v1209_v25, %v1208_v24 }
 0x277   : > { %v1882_v28 = vunpack.i.h.bf16 %v1880_v10  ;;  %v1881_v29 = vunpack.i.l.bf16 %v1880_v10  ;;  %v1771_v10 = vpack.c.bf16 %v1199_v8, %v1198_v31 }
 0x279   : > { %v940_v43 = vsel %vm938_vm11, %v937_v41, %v1882_v28  ;;  %v939_v44 = vsel %vm938_vm11, %v936_v42, %v1881_v29  ;;  %v1211_v28 = vld [vmem:[%s2281_s5 + $0x68] sm:$0xff] }
 0x27a   : > { %v1885_v21 = vpop.permute.xlu0 %1884  ;;  %v1789_v29 = vpack.c.bf16 %v1211_v28, %v1210_v27 }
 0x27b   : > { %v1887_v35 = vunpack.i.h.bf16 %v1885_v21  ;;  %v1886_v36 = vunpack.i.l.bf16 %v1885_v21  ;;  %v1206_v21 = vld [vmem:[%s2281_s5 + $0x40] sm:$0xff] }
 0x27c   : > { %v1783_v23 = vpack.c.bf16 %v1207_v22, %v1206_v21 }
 0x27d   : > { %v943_v46 = vsel %vm941_vm12, %v940_v43, %v1887_v35  ;;  %v942_v49 = vsel %vm941_vm12, %v939_v44, %v1886_v36  ;;  %v1214_v35 = vld [vmem:[%s2281_s5 + $0x80] sm:$0xff]  ;;  %v1215_v36 = vld [vmem:[%s2281_s5 + $0x88] sm:$0xff] }
 0x27e   : > { %v1890_v32 = vpop.permute.xlu1 %1889  ;;  %v1795_v37 = vpack.c.bf16 %v1215_v36, %v1214_v35 }
 0x27f   : > { %v1892_v39 = vunpack.i.h.bf16 %v1890_v32  ;;  %v1891_v40 = vunpack.i.l.bf16 %v1890_v32  ;;  %v1212_v32 = vld [vmem:[%s2281_s5 + $0x70] sm:$0xff] }
 0x280   : > { %v1792_v34 = vpack.c.bf16 %v1213_v33, %v1212_v32 }
 0x281   : > { %v946_v50 = vsel %vm944_vm13, %v943_v46, %v1892_v39  ;;  %v945_v51 = vsel %vm944_vm13, %v942_v49, %v1891_v40 }
 0x282   : > { %v1895_v45 = vpop.permute.xlu0 %1894 }
 0x283   : > { %v1897_v47 = vunpack.i.h.bf16 %v1895_v45  ;;  %v1896_v48 = vunpack.i.l.bf16 %v1895_v45 }
 0x285   : > { %v948_v52 = vsel %vm947_vm14, %v945_v51, %v1896_v48  ;;  %v949_v53 = vsel %vm947_vm14, %v946_v50, %v1897_v47 }
 0x286   : > { %1693 = vmatprep.mubr.f32.mxu0 %v948_v52 }
 0x287   : > { %1694 = vmatmul.mubr.f32.vlgmr.msra.gmra.mrb[8].mxu0 %v949_v53 }
 0x288   : > { %1700 = vmatprep.mubr.msk.f32.mxu0 %vm1922_vm15, %v1923_v55 }
 0x35a   : > { %v1695_v58 = vpop.f32.mrb[8].mxu0 }
 0x35b   : > { %v1042_v59 = vadd.f32 %v1695_v58, %v969_v57  ;;  %v1036_v60 = vpop.f32.mrb[9].mxu0 }
 0x35c   : > { %v1037_v61 = vadd.f32 %v1036_v60, %v969_v57 }
 0x35d   : > { %v1046_v62 = vmax.f32 %v1042_v59, 0.0 }
 0x35e   : > { %v1045_v63 = vmax.f32 %v1037_v61, 0.0 }
 0x360   : > { %v1768_v1 = vpack.c.bf16 %v1046_v62, %v1045_v63 }
 0x362   : > { %1769 = vmatpush3.bf16.msra.mxu0 %v1768_v1 }
 0x363   : > { %1770 = vmatprep.subr.bf16.mxu0 %v1921_v54 }
 0x365   : > { %1701 = vmatmul.mubr.msk.f32.vlgmr.msra.gmra.mrb[10].mxu0 %vm263_vm0, %v1484_v2  ;;  %v1218_v2 = vsub.s32 2, %v1991_v14 }
 0x366   : > { %1703 = vmatprep.mubr.msk.f32.mxu0 %vm1922_vm15, %v1923_v55  ;;  %1772 = vmatpush1.bf16.msra.mxu0 %v1771_v10 }
 0x367   : > { %1773 = vmatprep.subr.bf16.mxu0 %v1921_v54 }
 0x369   : > { %1704 = vmatmul.mubr.msk.f32.gmra.mrb[12].mxu0 %vm263_vm0, %v1485_v3  ;;  %v1219_v3 = vrot.slane %v1997_v16, %v1218_v2 }
 0x36a   : > { %1706 = vmatprep.mubr.msk.f32.mxu0 %vm1922_vm15, %v1923_v55  ;;  %1775 = vmatpush1.bf16.msra.mxu0 %v1774_v12 }
 0x36b   : > { %1776 = vmatprep.subr.bf16.mxu0 %v1921_v54 }
 0x36d   : > { %1707 = vmatmul.mubr.msk.f32.gmra.mrb[14].mxu0 %vm263_vm0, %v1488_v5 }
 0x36e   : > { %1709 = vmatprep.mubr.msk.f32.mxu0 %vm1922_vm15, %v1923_v55  ;;  %1778 = vmatpush1.bf16.msra.mxu0 %v1777_v17  ;;  %v1310_v17 = vrot.slane %v1997_v16, 1 }
 0x36f   : > { %1779 = vmatprep.subr.bf16.mxu0 %v1921_v54 }
 0x371   : > { %1710 = vmatmul.mubr.msk.f32.gmra.mrb[16].mxu0 %vm263_vm0, %v1489_v6 }
 0x372   : > { %1712 = vmatprep.mubr.msk.f32.mxu0 %vm1922_vm15, %v1923_v55  ;;  %1781 = vmatpush1.bf16.msra.mxu0 %v1780_v20 }
 0x373   : > { %1782 = vmatprep.subr.bf16.mxu0 %v1921_v54 }
 0x375   : > { %1713 = vmatmul.mubr.msk.f32.gmra.mrb[18].mxu0 %vm263_vm0, %v1056_v7 }
 0x376   : > { %1784 = vmatpush1.bf16.msra.mxu0 %v1783_v23 }
 0x377   : > { %1785 = vmatprep.subr.bf16.mxu0 %v1921_v54 }
 0x37a   : > { %1787 = vmatpush1.bf16.msra.mxu0 %v1786_v26 }
 0x37b   : > { %1788 = vmatprep.subr.bf16.mxu0 %v1921_v54 }
 0x37e   : > { %1790 = vmatpush1.bf16.msra.mxu0 %v1789_v29 }
 0x37f   : > { %1791 = vmatprep.subr.bf16.mxu0 %v1921_v54 }
 0x382   : > { %1793 = vmatpush1.bf16.msra.mxu0 %v1792_v34 }
 0x383   : > { %1794 = vmatprep.subr.bf16.mxu0 %v1921_v54 }
 0x386   : > { %1796 = vmatpush1.bf16.msra.mxu0 %v1795_v37 }
 0x438   : > { %v1138_v38 = vpop.f32.mrb[10].mxu0 }
 0x439   : > { %v1163_v39 = vrot.slane %v1138_v38, 4  ;;  %v1702_v40 = vpop.f32.mrb[11].mxu0 }
 0x43b   : > { %1164 = vrot.lane.b32.xlu1 %v1163_v39, %s1907_s20 }
 0x43c   : > { %v1143_v41 = vpop.f32.mrb[12].mxu0 }
 0x43d   : > { %v1171_v42 = vrot.slane %v1143_v41, 4  ;;  %1168 = vrot.lane.b32.xlu0 %v1143_v41, %s1909_s24  ;;  %v1705_v43 = vpop.f32.mrb[13].mxu0 }
 0x43f   : > { %1172 = vrot.lane.b32.xlu1 %v1171_v42, %s1911_s10  ;;  %s247_s10 = scalar_lea.vmem %s2282_s6, %s2284_s22 }
 0x440   : > { %v1148_v44 = vpop.f32.mrb[14].mxu0 }
 0x441   : > { %v1179_v45 = vrot.slane %v1148_v44, 4  ;;  %1176 = vrot.lane.b32.xlu0 %v1148_v44, %s1913_s23  ;;  %v1708_v46 = vpop.f32.mrb[15].mxu0 }
 0x443   : > { %1180 = vrot.lane.b32.xlu1 %v1179_v45, %s1915_s11 }
 0x444   : > { %v1153_v47 = vpop.f32.mrb[16].mxu0 }
 0x445   : > { %v1187_v48 = vrot.slane %v1153_v47, 4  ;;  %1184 = vrot.lane.b32.xlu0 %v1153_v47, %s1917_s26  ;;  %v1711_v49 = vpop.f32.mrb[17].mxu0 }
 0x447   : > { %1188 = vrot.lane.b32.xlu1 %v1187_v48, %s1919_s28 }
 0x448   : > { %v1158_v50 = vpop.f32.mrb[18].mxu0 }
 0x449   : > { %v1714_v51 = vpop.f32.mrb[19].mxu0  ;;  %1414 = vmatprep.mubr.msk.f32.mxu0 %vm263_vm0, %v1158_v50 }
 0x4ad   : > { %v1165_v52 = vpop.permute.xlu1 %1164 }
 0x4ae   : > { %v1191_v53 = vsel %vm263_vm0, %v1138_v38, %v1165_v52  ;;  %vm1294_vm0 = vcmask 257024  }
 0x4af   : > { %v1169_v54 = vpop.permute.xlu0 %1168 }
 0x4b0   : > { %v1192_v55 = vsel %vm915_vm4, %v1191_v53, %v1169_v54 }
 0x4b1   : > { %v1173_v56 = vpop.permute.xlu1 %1172 }
 0x4b2   : > { %v1193_v57 = vsel %vm921_vm6, %v1192_v55, %v1173_v56 }
 0x4b3   : > { %v1177_v58 = vpop.permute.xlu0 %1176 }
 0x4b4   : > { %v1194_v59 = vsel %vm465_vm1, %v1193_v57, %v1177_v58  ;;  %vm1305_vm1 = vcmask 257027  }
 0x4b5   : > { %v1181_v60 = vpop.permute.xlu1 %1180 }
 0x4b6   : > { %v1195_v61 = vsel %vm932_vm9, %v1194_v59, %v1181_v60 }
 0x4b7   : > { %v1185_v62 = vpop.permute.xlu0 %1184 }
 0x4b8   : > { %v1196_v63 = vsel %vm938_vm11, %v1195_v61, %v1185_v62 }
 0x4b9   : > { %v1189_v0 = vpop.permute.xlu1 %1188 }
 0x4ba   : > { %v1197_v1 = vsel %vm944_vm13, %v1196_v63, %v1189_v0 }
 0x4bb   : > { %1288 = vmatmul.mubr.f32.vlgmr.msra.gmra.mrb[20].mxu0 %v1197_v1 }
 0x58e   : > { %v1289_v4 = vpop.f32.mrb[20].mxu0 }
 0x58f   : > { %v1290_v5 = vadd.f32 %v1289_v4, %v1219_v3  ;;  %v1291_v6 = vpop.f32.mrb[21].mxu0 }
 0x591   : > { %v1293_v30 = vmax.f32 %v1290_v5, 0.0 }
 0x593   : > { %v1295_v7 = vsel %vm1294_vm0, %v1293_v30, 0.0 }
 0x594   : > { %v1296_v31 = vrot.slane %v1295_v7, 4 }
 0x596   : > { %v1297_v8 = vadd.f32 %v1296_v31, %v1295_v7 }
 0x598   : > { %v1298_v9 = vrot.slane %v1297_v8, 2 }
 0x59a   : > { %v1299_v10 = vadd.f32 %v1298_v9, %v1297_v8 }
 0x59c   : > { %v1300_v11 = vrot.slane %v1299_v10, 1 }
 0x59e   : > { %v1301_v12 = vadd.f32 %v1300_v11, %v1299_v10 }
 0x5a0   : > { %v1303_v13 = vmul.f32 0.25, %v1301_v12 }
 0x5a2   : > { %v1304_v15 = vmul.f32 %v1303_v13, %v1997_v16 }
 0x5a4   : > { %v1306_v14 = vsel %vm1305_vm1, %v1304_v15, 0.0 }
 0x5a5   : > { %1307 = vadd.xlane.f32.xlu0 %v1306_v14 }
 0x632   : > { %v1308_v18 = vpop.xlane.xlu0 %1307 }
 0x633   : > { %v1312_v19 = vadd.f32 %v1310_v17, %v1308_v18 }
 0x635   : > { %1314 = vst.msk [vmem:[%s247_s10 - $0x3] sm:$0x8] %vm1313_vm2, %v1312_v19 }
 0x636 PF: > { %s16_s21 = sadd.s32 1, %s1904_s21  }
 0x637   : > { %p13_p4 = scmp.ge.s32.totalorder %s16_s21, 4  }
 0x639   :  { %15 = sbr.rel (!%p13_p4) target bundleno = 1 (0x1), region = 74 }

</bundles_post_ra>
